<compile_context>
chip_gen: v6e
topology: v6e:2x2x1
jax: 0.10.0
libtpu: 0.0.40
codegen_flags: <defaults>
</compile_context>

<pallas_src>
import jax
import jax.numpy as jnp
from jax.experimental import pallas as pl
from jax.experimental.pallas import tpu as pltpu


# -----------------------------------------------------------------------------
# PREP kernel: once per forward over the (n_in, n_hid) weight plane.
# -----------------------------------------------------------------------------
def _make_prep_kernel(lambda_o, lambda_2, n_in, n_hid, n_dim):
    inv_count = 1.0 / float(n_in * n_hid)

    def kernel(w_ref, u_ref, vt_ref, weff_ref, reg_ref):
        nj = pl.program_id(0)                       # n_hid-tile index (reg reduction axis)

        u = u_ref[...]                              # (n_in, n_dim)   n_dim on lanes
        vt = vt_ref[...]                            # (n_dim, tn)     tn on lanes

        # Gaussian distance on the VPU, statically unrolled over the tiny n_dim (=5).
        diff = u[:, 0:1] - vt[0:1, :]               # (n_in, tn)
        dist2 = diff * diff
        for d in range(1, n_dim):
            diff = u[:, d:d + 1] - vt[d:d + 1, :]
            dist2 = dist2 + diff * diff
        w_hat = jnp.exp(-dist2)                     # (n_in, tn)   EUP

        w = w_ref[...]                              # (n_in, tn)

        # Regularizer partial sum, accumulated into the resident (1,1) output block.
        partial = (lambda_o * jnp.sum(w_hat * w_hat)
                   + lambda_2 * jnp.sum(w * w)) * inv_count

        @pl.when(nj == 0)
        def _():
            reg_ref[...] = jnp.zeros_like(reg_ref)

        reg_ref[...] = reg_ref[...] + partial

        # Locally-kernelised weight, emitted in the MXU operand dtype (bf16 by default).
        weff_ref[...] = (w * w_hat).astype(weff_ref.dtype)

    return kernel


def _compute_w_eff_and_reg(W, u, vt, *, lambda_o, lambda_2, w_eff_dtype, tn):
    n_in, n_hid = W.shape
    n_dim = u.shape[1]
    assert n_hid % tn == 0
    nn = n_hid // tn

    kernel = _make_prep_kernel(lambda_o, lambda_2, n_in, n_hid, n_dim)
    w_bytes = jnp.dtype(w_eff_dtype).itemsize
    flops = n_in * n_hid * (3 * n_dim + 6)
    bytes_accessed = (4 * (n_in * n_hid + n_in * n_dim + n_dim * n_hid + 1)
                      + w_bytes * n_in * n_hid)

    w_eff, reg = pl.pallas_call(
        kernel,
        out_shape=(
            jax.ShapeDtypeStruct((n_in, n_hid), w_eff_dtype),
            jax.ShapeDtypeStruct((1, 1), jnp.float32),
        ),
        grid=(nn,),
        in_specs=[
            pl.BlockSpec((n_in, tn), lambda nj: (0, nj)),       # W
            pl.BlockSpec((n_in, n_dim), lambda nj: (0, 0)),     # u
            pl.BlockSpec((n_dim, tn), lambda nj: (0, nj)),      # v^T
        ],
        out_specs=(
            pl.BlockSpec((n_in, tn), lambda nj: (0, nj)),       # w_eff
            pl.BlockSpec((1, 1), lambda nj: (0, 0)),            # reg (resident accumulator)
        ),
        compiler_params=pltpu.CompilerParams(
            dimension_semantics=("arbitrary",)),
        cost_estimate=pl.CostEstimate(
            flops=int(flops),
            transcendentals=int(n_in * n_hid),
            bytes_accessed=int(bytes_accessed)),
    )(W, u, vt)
    return w_eff, reg[0, 0]


# -----------------------------------------------------------------------------
# HOT kernel: y = sigmoid(x @ w_eff + b), tiled (batch, n_hid), both axes parallel.
# -----------------------------------------------------------------------------
def _make_gemm_kernel(matmul_dtype):
    def kernel(x_ref, weff_ref, b_ref, y_ref):
        x = x_ref[...]                              # (tb, n_in)
        w_eff = weff_ref[...]                       # (n_in, tn)  already matmul dtype
        if matmul_dtype is not None:
            x = x.astype(matmul_dtype)
            w_eff = w_eff.astype(matmul_dtype)      # no-op if already cast by prep
        y = jnp.dot(x, w_eff, preferred_element_type=jnp.float32) + b_ref[...]
        y_ref[...] = jax.nn.sigmoid(y).astype(y_ref.dtype)

    return kernel


def _gemm_bias_sigmoid(x, w_eff, b2, *, matmul_dtype, out_dtype, tb, tn, vmem_limit):
    B, n_in = x.shape
    n_hid = w_eff.shape[1]
    assert B % tb == 0 and n_hid % tn == 0
    nb, nn = B // tb, n_hid // tn

    kernel = _make_gemm_kernel(matmul_dtype)
    w_bytes = jnp.dtype(w_eff.dtype).itemsize
    y_bytes = jnp.dtype(out_dtype).itemsize
    # x block index is constant along the inner n_hid axis -> x stays resident (no nn factor).
    bytes_accessed = (4 * B * n_in
                      + nb * n_in * n_hid * w_bytes
                      + nb * n_hid * 4
                      + B * n_hid * y_bytes)

    return pl.pallas_call(
        kernel,
        out_shape=jax.ShapeDtypeStruct((B, n_hid), out_dtype),
        grid=(nb, nn),
        in_specs=[
            pl.BlockSpec((tb, n_in), lambda bi, nj: (bi, 0)),   # x (resident across nj)
            pl.BlockSpec((n_in, tn), lambda bi, nj: (0, nj)),   # w_eff
            pl.BlockSpec((1, tn), lambda bi, nj: (0, nj)),      # b
        ],
        out_specs=pl.BlockSpec((tb, tn), lambda bi, nj: (bi, nj)),
        compiler_params=pltpu.CompilerParams(
            dimension_semantics=("parallel", "parallel"),
            vmem_limit_bytes=int(vmem_limit)),
        cost_estimate=pl.CostEstimate(
            flops=int(2 * B * n_in * n_hid),
            transcendentals=int(B * n_hid),
            bytes_accessed=int(bytes_accessed)),
    )(x, w_eff, b2)


# -----------------------------------------------------------------------------
# Tile selection / VMEM budgeting
# -----------------------------------------------------------------------------
def _pick_tile(dim, cap, quantum):
    """Largest tile <= cap that is a multiple of `quantum` and divides `dim` (else full dim)."""
    if dim <= cap:
        return dim
    t = (cap // quantum) * quantum
    while t >= quantum:
        if dim % t == 0:
            return t
        t -= quantum
    return dim


def _pick_tb(B, cap):
    # Guarantee >= 2 batch tiles when possible so v7x's two TensorCores both get work.
    if B >= 16:
        cap = min(cap, B // 2)
    # Prefer 128-aligned M tiles (fills MXU rows), fall back to 8-aligned.
    if cap >= 128:
        t = _pick_tile(B, cap, 128)
        if t <= cap:
            return t
    return _pick_tile(B, cap, 8)


def _hot_vmem_bytes(tb, tn, n_in, w_bytes, y_bytes):
    # Double-buffered inputs/outputs of the hot kernel.
    x_b = tb * n_in * 4
    w_b = n_in * tn * w_bytes
    b_b = tn * 4
    y_b = tb * tn * y_bytes
    return 2 * (x_b + w_b + b_b + y_b)


# -----------------------------------------------------------------------------
# Public forward
# -----------------------------------------------------------------------------
def encoder_forward(x, W, u, v, b, *, lambda_o=0.013, lambda_2=60.0,
                    tb=None, tn=None, matmul_dtype=jnp.bfloat16,
                    out_dtype=jnp.float32):
    """x: (B, n_in); W: (n_in, n_hid); u: (n_in, n_dim); v: (n_hid, n_dim); b: (n_hid,)."""
    B, n_in = x.shape
    n_in_w, n_hid = W.shape
    assert n_in_w == n_in
    n_dim = u.shape[1]
    assert u.shape == (n_in, n_dim) and v.shape == (n_hid, n_dim) and b.shape == (n_hid,)

    if tb is None:
        tb = _pick_tb(B, 512)
    if tn is None:
        tn = _pick_tile(n_hid, 512, 128)
    assert B % tb == 0 and n_hid % tn == 0

    w_eff_dtype = matmul_dtype if matmul_dtype is not None else jnp.float32
    w_bytes = jnp.dtype(w_eff_dtype).itemsize
    y_bytes = jnp.dtype(out_dtype).itemsize

    # Keep the double-buffered working set comfortably inside v7x's 64 MiB VMEM.
    VMEM_BUDGET = 40 * 1024 * 1024
    while _hot_vmem_bytes(tb, tn, n_in, w_bytes, y_bytes) > VMEM_BUDGET:
        if tn > 128 and tn % 2 == 0 and (tn // 2) % 128 == 0 and n_hid % (tn // 2) == 0:
            tn //= 2
        elif tb > 8 and tb % 2 == 0 and B % (tb // 2) == 0:
            tb //= 2
        else:
            break
    vmem_est = _hot_vmem_bytes(tb, tn, n_in, w_bytes, y_bytes)
    vmem_limit = min(max(2 * vmem_est, 16 << 20), 48 << 20)

    x = x.astype(jnp.float32)
    W = W.astype(jnp.float32)
    u = u.astype(jnp.float32)
    vt = v.astype(jnp.float32).T                    # (n_dim, n_hid): lane-dense in the kernel
    b2 = b.astype(jnp.float32).reshape(1, n_hid)

    # 1) Once-per-forward: gaussian kernel, regularizer, w_eff = W * w_hat.
    w_eff, reg = _compute_w_eff_and_reg(
        W, u, vt, lambda_o=float(lambda_o), lambda_2=float(lambda_2),
        w_eff_dtype=w_eff_dtype, tn=tn)

    # 2) Hot path: tiled GEMM + bias + sigmoid.
    y = _gemm_bias_sigmoid(
        x, w_eff, b2, matmul_dtype=matmul_dtype, out_dtype=out_dtype,
        tb=tb, tn=tn, vmem_limit=vmem_limit)
    return y, reg


def encoder_reference(x, W, u, v, b, *, lambda_o=0.013, lambda_2=60.0):
    diff = u[:, None, :] - v[None, :, :]
    w_hat = jnp.exp(-jnp.sum(diff * diff, axis=-1))
    reg = lambda_o * jnp.mean(w_hat ** 2) + lambda_2 * jnp.mean(W ** 2)
    y = jax.nn.sigmoid(x @ (W * w_hat) + b)
    return y, reg


if __name__ == "__main__":
    # Module-consistent small shapes: batch=16, n_input=32, kernel_hidden=256, n_dim=5.
    B, n_in, n_hid, n_dim = 16, 32, 256, 5
    lambda_o, lambda_2 = 0.013, 60.0

    key = jax.random.PRNGKey(0)
    kx, kw, ku, kv, kb = jax.random.split(key, 5)
    x = jax.random.normal(kx, (B, n_in), jnp.float32)
    W = jax.random.normal(kw, (n_in, n_hid), jnp.float32) * 0.1
    u = jax.random.normal(ku, (n_in, n_dim), jnp.float32) * 0.5
    v = jax.random.normal(kv, (n_hid, n_dim), jnp.float32) * 0.5
    b = jax.random.normal(kb, (n_hid,), jnp.float32) * 0.1

    y_exp, reg_exp = encoder_reference(x, W, u, v, b, lambda_o=lambda_o, lambda_2=lambda_2)

    # Exactness check: f32 MXU operands, explicit small tiles (exercises grid (2, 2) in the
    # hot kernel and the 2-tile regularizer accumulation in the prep kernel).
    y32, reg32 = encoder_forward(x, W, u, v, b, lambda_o=lambda_o, lambda_2=lambda_2,
                                 tb=8, tn=128, matmul_dtype=None)
    jax.block_until_ready((y32, reg32))
    assert y32.shape == (B, n_hid)
    assert jnp.allclose(y32, y_exp, atol=1e-5, rtol=1e-5), \
        float(jnp.max(jnp.abs(y32 - y_exp)))
    assert jnp.allclose(reg32, reg_exp, atol=1e-5, rtol=1e-5), (float(reg32), float(reg_exp))

    # Default performance path: bf16 MXU operands (f32 accumulation), auto tile selection.
    y, reg = encoder_forward(x, W, u, v, b, lambda_o=lambda_o, lambda_2=lambda_2)
    jax.block_until_ready((y, reg))
    assert y.shape == (B, n_hid)
    assert jnp.allclose(y, y_exp, atol=2e-2, rtol=2e-2), float(jnp.max(jnp.abs(y - y_exp)))
    assert jnp.allclose(reg, reg_exp, atol=1e-5, rtol=1e-5), (float(reg), float(reg_exp))

    print("KERNEL_OK")
</pallas_src>

<mosaic_0001>
module attributes {stable_mosaic.version = 11 : i64} {
  func.func @kernel(%arg0: i32, %arg1: memref<32x128xf32, #tpu.memory_space<vmem>>, %arg2: memref<32x5xf32, #tpu.memory_space<vmem>>, %arg3: memref<5x128xf32, #tpu.memory_space<vmem>>, %arg4: memref<32x128xf32, #tpu.memory_space<vmem>>, %arg5: memref<1x1xf32, #tpu.memory_space<vmem>>) attributes {dimension_semantics = [#tpu.dimension_semantics<arbitrary>], iteration_bounds = array<i64: 2>, scalar_prefetch = 0 : i64, scratch_operands = 0 : i64, tpu.core_type = #tpu.core_type<tc>, window_params = [{transform_indices = @transform_0, window_bounds = array<i64: 32, 128>}, {pipeline_mode = #tpu.pipeline_mode<synchronous>, transform_indices = @transform_1, window_bounds = array<i64: 32, 5>}, {transform_indices = @transform_2, window_bounds = array<i64: 5, 128>}, {transform_indices = @transform_3, window_bounds = array<i64: 32, 128>}, {pipeline_mode = #tpu.pipeline_mode<synchronous>, transform_indices = @transform_4, window_bounds = array<i64: 1, 1>}]} {
    %c0 = arith.constant 0 : index
    %c0_0 = arith.constant 0 : index
    %0 = vector.load %arg2[%c0, %c0_0] : memref<32x5xf32, #tpu.memory_space<vmem>>, vector<32x5xf32>
    %c0_1 = arith.constant 0 : index
    %c0_2 = arith.constant 0 : index
    %1 = vector.load %arg3[%c0_1, %c0_2] : memref<5x128xf32, #tpu.memory_space<vmem>>, vector<5x128xf32>
    %2 = vector.extract_strided_slice %0 {offsets = [0, 0], sizes = [32, 1], strides = [1, 1]} : vector<32x5xf32> to vector<32x1xf32>
    %3 = vector.extract_strided_slice %1 {offsets = [0, 0], sizes = [1, 128], strides = [1, 1]} : vector<5x128xf32> to vector<1x128xf32>
    %4 = vector.broadcast %2 : vector<32x1xf32> to vector<32x128xf32>
    %5 = vector.broadcast %3 : vector<1x128xf32> to vector<32x128xf32>
    %6 = arith.subf %4, %5 : vector<32x128xf32>
    %7 = arith.mulf %6, %6 : vector<32x128xf32>
    %8 = vector.extract_strided_slice %0 {offsets = [0, 1], sizes = [32, 1], strides = [1, 1]} : vector<32x5xf32> to vector<32x1xf32>
    %9 = vector.extract_strided_slice %1 {offsets = [1, 0], sizes = [1, 128], strides = [1, 1]} : vector<5x128xf32> to vector<1x128xf32>
    %10 = vector.broadcast %8 : vector<32x1xf32> to vector<32x128xf32>
    %11 = vector.broadcast %9 : vector<1x128xf32> to vector<32x128xf32>
    %12 = arith.subf %10, %11 : vector<32x128xf32>
    %13 = arith.mulf %12, %12 : vector<32x128xf32>
    %14 = arith.addf %7, %13 : vector<32x128xf32>
    %15 = vector.extract_strided_slice %0 {offsets = [0, 2], sizes = [32, 1], strides = [1, 1]} : vector<32x5xf32> to vector<32x1xf32>
    %16 = vector.extract_strided_slice %1 {offsets = [2, 0], sizes = [1, 128], strides = [1, 1]} : vector<5x128xf32> to vector<1x128xf32>
    %17 = vector.broadcast %15 : vector<32x1xf32> to vector<32x128xf32>
    %18 = vector.broadcast %16 : vector<1x128xf32> to vector<32x128xf32>
    %19 = arith.subf %17, %18 : vector<32x128xf32>
    %20 = arith.mulf %19, %19 : vector<32x128xf32>
    %21 = arith.addf %14, %20 : vector<32x128xf32>
    %22 = vector.extract_strided_slice %0 {offsets = [0, 3], sizes = [32, 1], strides = [1, 1]} : vector<32x5xf32> to vector<32x1xf32>
    %23 = vector.extract_strided_slice %1 {offsets = [3, 0], sizes = [1, 128], strides = [1, 1]} : vector<5x128xf32> to vector<1x128xf32>
    %24 = vector.broadcast %22 : vector<32x1xf32> to vector<32x128xf32>
    %25 = vector.broadcast %23 : vector<1x128xf32> to vector<32x128xf32>
    %26 = arith.subf %24, %25 : vector<32x128xf32>
    %27 = arith.mulf %26, %26 : vector<32x128xf32>
    %28 = arith.addf %21, %27 : vector<32x128xf32>
    %29 = vector.extract_strided_slice %0 {offsets = [0, 4], sizes = [32, 1], strides = [1, 1]} : vector<32x5xf32> to vector<32x1xf32>
    %30 = vector.extract_strided_slice %1 {offsets = [4, 0], sizes = [1, 128], strides = [1, 1]} : vector<5x128xf32> to vector<1x128xf32>
    %31 = vector.broadcast %29 : vector<32x1xf32> to vector<32x128xf32>
    %32 = vector.broadcast %30 : vector<1x128xf32> to vector<32x128xf32>
    %33 = arith.subf %31, %32 : vector<32x128xf32>
    %34 = arith.mulf %33, %33 : vector<32x128xf32>
    %35 = arith.addf %28, %34 : vector<32x128xf32>
    %cst = arith.constant 0.000000e+00 : f32
    %36 = vector.broadcast %cst : f32 to vector<32x128xf32>
    %37 = arith.subf %36, %35 : vector<32x128xf32>
    %38 = math.exp %37 : vector<32x128xf32>
    %c0_3 = arith.constant 0 : index
    %c0_4 = arith.constant 0 : index
    %39 = vector.load %arg1[%c0_3, %c0_4] : memref<32x128xf32, #tpu.memory_space<vmem>>, vector<32x128xf32>
    %40 = arith.mulf %38, %38 : vector<32x128xf32>
    %41 = vector.shape_cast %40 : vector<32x128xf32> to vector<1x32x128xf32>
    %cst_5 = arith.constant dense<0.000000e+00> : vector<1xf32>
    %42 = vector.multi_reduction <add>, %41, %cst_5 [1, 2] : vector<1x32x128xf32> to vector<1xf32>
    %43 = vector.shape_cast %42 : vector<1xf32> to vector<1x1x1xf32>
    %44 = vector.extract %43[0, 0, 0] : f32 from vector<1x1x1xf32>
    %cst_6 = arith.constant 1.300000e-02 : f32
    %45 = arith.mulf %cst_6, %44 : f32
    %46 = arith.mulf %39, %39 : vector<32x128xf32>
    %47 = vector.shape_cast %46 : vector<32x128xf32> to vector<1x32x128xf32>
    %cst_7 = arith.constant dense<0.000000e+00> : vector<1xf32>
    %48 = vector.multi_reduction <add>, %47, %cst_7 [1, 2] : vector<1x32x128xf32> to vector<1xf32>
    %49 = vector.shape_cast %48 : vector<1xf32> to vector<1x1x1xf32>
    %50 = vector.extract %49[0, 0, 0] : f32 from vector<1x1x1xf32>
    %cst_8 = arith.constant 6.000000e+01 : f32
    %51 = arith.mulf %cst_8, %50 : f32
    %52 = arith.addf %45, %51 : f32
    %cst_9 = arith.constant 1.22070313E-4 : f32
    %53 = arith.mulf %52, %cst_9 : f32
    %c0_i32 = arith.constant 0 : i32
    %54 = arith.cmpi eq, %arg0, %c0_i32 : i32
    %55 = arith.extui %54 : i1 to i32
    %c0_i32_10 = arith.constant 0 : i32
    %56 = arith.cmpi ne, %55, %c0_i32_10 : i32
    scf.if %56 {
      %cst_17 = arith.constant 0.000000e+00 : f32
      %63 = vector.broadcast %cst_17 : f32 to vector<1x1xf32>
      %c0_18 = arith.constant 0 : index
      %c0_19 = arith.constant 0 : index
      %64 = vector.load %arg5[%c0_18, %c0_19] : memref<1x1xf32, #tpu.memory_space<vmem>>, vector<1x1xf32>
      tpu.vector_store %arg5[%c0_18, %c0_19], %63 {strides = array<i32>} : memref<1x1xf32, #tpu.memory_space<vmem>>, vector<1x1xf32>,
    } else {
    }
    %c0_11 = arith.constant 0 : index
    %c0_12 = arith.constant 0 : index
    %57 = vector.load %arg5[%c0_11, %c0_12] : memref<1x1xf32, #tpu.memory_space<vmem>>, vector<1x1xf32>
    %58 = vector.broadcast %53 : f32 to vector<1x1xf32>
    %59 = arith.addf %57, %58 : vector<1x1xf32>
    %c0_13 = arith.constant 0 : index
    %c0_14 = arith.constant 0 : index
    %60 = vector.load %arg5[%c0_13, %c0_14] : memref<1x1xf32, #tpu.memory_space<vmem>>, vector<1x1xf32>
    tpu.vector_store %arg5[%c0_13, %c0_14], %59 {strides = array<i32>} : memref<1x1xf32, #tpu.memory_space<vmem>>, vector<1x1xf32>,
    %61 = arith.mulf %39, %38 : vector<32x128xf32>
    %c0_15 = arith.constant 0 : index
    %c0_16 = arith.constant 0 : index
    %62 = vector.load %arg4[%c0_15, %c0_16] : memref<32x128xf32, #tpu.memory_space<vmem>>, vector<32x128xf32>
    tpu.vector_store %arg4[%c0_15, %c0_16], %61 {strides = array<i32>} : memref<32x128xf32, #tpu.memory_space<vmem>>, vector<32x128xf32>,
    return
  }
  func.func @transform_0(%arg0: i32) -> (i32, i32) {
    %c0_i32 = arith.constant 0 : i32
    %c0_i32_0 = arith.constant 0 : i32
    return %c0_i32, %arg0 : i32, i32
  }
  func.func @transform_1(%arg0: i32) -> (i32, i32) {
    %c0_i32 = arith.constant 0 : i32
    %c0_i32_0 = arith.constant 0 : i32
    %c0_i32_1 = arith.constant 0 : i32
    return %c0_i32, %c0_i32_0 : i32, i32
  }
  func.func @transform_2(%arg0: i32) -> (i32, i32) {
    %c0_i32 = arith.constant 0 : i32
    %c0_i32_0 = arith.constant 0 : i32
    return %c0_i32, %arg0 : i32, i32
  }
  func.func @transform_3(%arg0: i32) -> (i32, i32) {
    %c0_i32 = arith.constant 0 : i32
    %c0_i32_0 = arith.constant 0 : i32
    return %c0_i32, %arg0 : i32, i32
  }
  func.func @transform_4(%arg0: i32) -> (i32, i32) {
    %c0_i32 = arith.constant 0 : i32
    %c0_i32_0 = arith.constant 0 : i32
    %c0_i32_1 = arith.constant 0 : i32
    return %c0_i32, %c0_i32_0 : i32, i32
  }
}

</mosaic_0001>

<bundles_post_ra>
// kernel: tpu_custom_call.1
= control target key start
LH: loop header
LB: loop body
LE: loop exit
PB: predicated region body
PF: predicated region fallthrough
CT: control target
= control target key end

     0   :  { %10 = vsyncpa [#allocation3], 0  ;;  %s1074_s0 = inlined_call_operand.hbm [shape: f32[32,256], index: 0, kind: input, shape index: {}]   ;;  %s1075_s1 = inlined_call_operand.vmem [shape: f32[32,5], index: 1, kind: input, shape index: {}]   ;;  %s1076_s2 = inlined_call_operand.vmem [shape: f32[5,256], index: 2, kind: input, shape index: {}]   ;;  %s1077_s3 = inlined_call_operand.hbm [shape: f32[32,256], index: 3, kind: output, shape index: {0}]   ;;  %s1078_s4 = inlined_call_operand.hbm [shape: f32[1,1], index: 4, kind: output, shape index: {1}]  }
   0x1   :  { %12 = vsyncpa [#allocation3 + $0x1], 0 }
   0x2   :  { %13 = vsyncpa [#allocation4], 0 }
   0x3   :  { %15 = vsyncpa [#allocation4 + $0x1], 0 }
   0x4   :  { %16 = vsyncpa [#allocation7], 0  ;;  %s857_s15 = smov 0   ;;  %s859_s16 = smov 0  }
   0x5   :  { %s861_s17 = smov 0   ;;  %s863_s18 = smov 0  }
   0x6 LB: > { %s878_s19 = sadd.s32 4294967295, %s815_s18   ;;  %s587_s20 = sadd.s32 4294967294, %s815_s18   ;;  %s815_s18 = sphi %s863_s18, %s1099_s18   ;;  %s811_s17 = sphi %s861_s17, %s1098_s17   ;;  %s807_s16 = sphi %s859_s16, %s1097_s16   ;;  %s803_s15 = sphi %s857_s15, %s1096_s15  }
   0x7   : > { %s882_s21 = sadd.s32 1, %s815_s18   ;;  %s29_s22 = sadd.s32 1, %s811_s17 }
   0x8   : > { %s26_s23 = ssub.s32 %s815_s18, %s882_s21  ;;  %p36_p0 = scmp.ne.s32.totalorder %s811_s17, %s807_s16 }
   0x9   : > { %p27_p1 = scmp.eq.s32.totalorder %s26_s23, 0  ;;  %p37_p2 = scmp.eq.s32.totalorder %s815_s18, 0 }
   0xa   : > { %p42_p3 = scmp.ne.s32.totalorder %s807_s16, %s803_s15  ;;  %p43_p4 = scmp.eq.s32.totalorder %s878_s19, 0 }
   0xb   : > { %s894_s24 = scalar_select %p27_p1, %s811_s17, %s29_s22  }
   0xc   : > { %p896_p5 = por %p37_p2, %p36_p0  ;;  %p900_p6 = por %p43_p4, %p42_p3 }
   0xd   : > { %p1079_p7 = scmp.eq.s32.totalorder %s878_s19, 1  ;;  %p119_p8 = scmp.eq.s32.totalorder %s587_s20, 1 }
   0xe   : > { %s1083_s26 = scalar_select %p900_p6, 1, 0 }
   0xf   : > { %p623_p10 = scmp.lt.s32.totalorder %s815_s18, 2  ;;  %p909_p11 = por %p1079_p7, %p36_p0 }
  0x10   : > { %p913_p12 = por %p119_p8, %p42_p3  ;;  %s163_s29 = sand.u32 1, %s811_s17  }
  0x11   : > { %s1084_s27 = scalar_select %p909_p11, 1, 0 }
  0x12   : > { %s1085_s28 = scalar_select %p913_p12, 1, 0 }
  0x13   : > { %s591_s30 = sshll.u32 %s815_s18, 7  ;;  %s590_s5 = sshll.u32 %s163_s29, 5 }
  0x14   : > { %s922_s8 = scalar_lea.hbm %s1074_s0, %s591_s30  ;;  %s167_s9 = scalar_lea.vmem [#allocation2], %s590_s5 }
  0x15   : > { %s173_s10 = sshll.u32 %s167_s9, 4  ;;  %p926_p13 = pnand %p623_p10, %p896_p5  ;;  %s930_s10 = int_to_ptr.vmem [resolvable:$true] %s173_s10 }
  0x16   : > { %s933_s12 = scalar_lea.sflag [#allocation3], %s163_s29  ;;  %s695_s13 = scalar_lea.hbm %s922_s8, 512 }
  0x17   : > { %p696_p1 = scmp.ne.s32.totalorder %s922_s8, %s695_s13  ;;  %p697_p2 = pneg %p926_p13 }
  0x18   : > { %s700_s22 = scalar_lea.hbm %s1074_s0, 1024  ;;  %p701_p5 = scmp.lt.s32.totalorder %s922_s8, %s1074_s0 }
  0x19   : > { %p698_p3 = pnand %p697_p2, %p696_p1  ;;  %p702_p8 = scmp.lt.s32.totalorder %s700_s22, %s695_s13 }
  0x1b   : > { %p699_p4 = pneg %p698_p3  ;;  %p703_p10 = por %p702_p8, %p701_p5 }
  0x1d   : > { %p704_p9 = pnand %p703_p10, %p699_p4 }
  0x1f   : > { %707 = shalt.err (!%p704_p9)
}
  0x20   : > { %s708_s29 = scalar_lea.vmem %s930_s10, 512  ;;  %s817_s30 = smov [#allocation2]  }
  0x21   : > { %p709_p7 = scmp.ne.s32.totalorder %s930_s10, %s708_s29  ;;  %s713_s5 = sshll.u32 %s817_s30, 4  ;;  %s714_s5 = int_to_ptr.vmem [resolvable:$false] %s713_s5 }
  0x22   : > { %s715_s6 = scalar_lea.vmem %s714_s5, 1024  ;;  %p716_p3 = scmp.lt.s32.totalorder %s930_s10, %s714_s5 }
  0x23   : > { %p711_p0 = pnand %p709_p7, %p697_p2  ;;  %p717_p12 = scmp.lt.s32.totalorder %s715_s6, %s708_s29 }
  0x25   : > { %p712_p1 = pneg %p711_p0  ;;  %p718_p11 = por %p717_p12, %p716_p3 }
  0x27   : > { %p719_p6 = pnand %p718_p11, %p712_p1 }
  0x29   : > { %722 = shalt.err (!%p719_p6)
}
  0x2a   : > { %s818_s7 = smov 256   ;;  %s819_s9 = smov 128  }
  0x2b   : > { %s820_s13 = smov 8   ;;  %p188_p7 = scmp.lt.s32.totalorder %s815_s18, 3 }
  0x2c   : > { %618 = dma.hbm_to_vmem [thread:$0]  (!%p926_p13), %s922_s8, 512, %s930_s10, %s933_s12, %s818_s7, %s819_s9, %s820_s13  }
  0x2d   : > { %p1087_p9 = scmp.ge.s32.totalorder %s815_s18, 1 }
  0x2f   : > { %p189_p0 = pnand %p1087_p9, %p188_p7 }
  0x30   : > { %s958_s14 = sand.u32 (!%p189_p0), 1, %s807_s16   ;;  %p1088_p6 = scmp.ne.s32.totalorder (!%p189_p0), %s1083_s26, 0 }
  0x31   : > { %192 = sbr.rel (%p189_p0) target bundleno = 515 (0x203), region = 32  ;;  %s593_s20 = sshll.u32 (!%p189_p0), %s958_s14, 5 }
  0x32   : > { %s195_s22 = scalar_lea.sflag (!%p189_p0), [#allocation3], %s958_s14  ;;  %s964_s23 = scalar_lea.vmem (!%p189_p0), [#allocation2], %s593_s20 }
  0x36   : > { %790 = dma.done.wait (%p1088_p6), %s195_s22, 512  }
  0x37   : > { %792 = vsyncadd (%p1088_p6), %s195_s22, 4294966784  ;;  %v821_v0 = vmov 1   ;;  %v822_v1 = vmov 0   ;;  %v231_v2 = vld [vmem:[%s1075_s1] sm:$0xff]  ;;  %v232_v3 = vld [vmem:[%s1075_s1 + $0x8] sm:$0xff]  ;;  %v823_v5 = vmov 2   ;;  %v256_v25 = vlaneseq }
  0x38   : > { %673 = vset.pattern.permute.xlu1 %v821_v0  ;;  %672 = vset.pattern.permute.xlu0 %v822_v1  ;;  %v233_v4 = vld [vmem:[%s1075_s1 + $0x10] sm:$0xff]  ;;  %v234_v6 = vld [vmem:[%s1075_s1 + $0x18] sm:$0xff]  ;;  %v824_v7 = vmov 3   ;;  %v825_v8 = vmov 4   ;;  %v983_v9 = vld [vmem:[%s964_s23] sm:$0xff]  ;;  %p227_p11 = scmp.lt.s32.totalorder %s878_s19, 1 }
  0x39   : > { %269 = vperm.xlu1 %673, %v231_v2   ;;  %238 = vperm.xlu0 %672, %v231_v2   ;;  %v986_v10 = vld [vmem:[%s964_s23 + $0x8] sm:$0xff]  ;;  %v429_v11 = vmul.f32 %v983_v9, %v983_v9  ;;  %v993_v13 = vld [vmem:[%s964_s23 + $0x10] sm:$0xff]  ;;  %v998_v16 = vld [vmem:[%s964_s23 + $0x18] sm:$0xff]  ;;  %v257_v28 = vshrl.u32 %v256_v25, 7  ;;  %s224_s25 = scalar_lea.vmem [#allocation5], %s593_s20  ;;  %p596_p12 = scmp.ne.s32.totalorder %s878_s19, 0 }
  0x3a   : > { %v430_v12 = vmul.f32 %v986_v10, %v986_v10  ;;  %v431_v14 = vmul.f32 %v993_v13, %v993_v13  ;;  %v432_v17 = vmul.f32 %v998_v16, %v998_v16  ;;  %s228_s5 = scalar_select %p227_p11, %s878_s19, 1 }
  0x3b   : > { %v286_v31 = vsub.s32 1, %v257_v28  ;;  %v258_v32 = vsub.s32 0, %v257_v28  ;;  %v318_v34 = vsub.s32 2, %v257_v28  ;;  %v350_v40 = vsub.s32 3, %v257_v28 }
  0x3c   : > { %v433_v15 = vadd.f32 %v430_v12, %v429_v11  ;;  %s595_s6 = sshll.u32 %s228_s5, 3  ;;  %v382_v44 = vsub.s32 4, %v257_v28 }
  0x3d   : > { %273 = vperm.xlu1 %673, %v232_v3   ;;  %243 = vperm.xlu0 %672, %v232_v3   ;;  %s230_s13 = scalar_lea.vmem %s1076_s2, %s595_s6 }
  0x3e   : > { %v434_v18 = vadd.f32 %v433_v15, %v431_v14  ;;  %v235_v33 = vld [vmem:[%s230_s13] sm:$0x1f] }
  0x3f   : > { %v287_v35 = vrot.slane %v235_v33, %v286_v31  ;;  %v259_v36 = vrot.slane %v235_v33, %v258_v32  ;;  %v319_v39 = vrot.slane %v235_v33, %v318_v34  ;;  %v351_v47 = vrot.slane %v235_v33, %v350_v40 }
  0x40   : > { %v435_v19 = vadd.f32 %v434_v18, %v432_v17  ;;  %v383_v53 = vrot.slane %v235_v33, %v382_v44 }
  0x41   : > { %277 = vperm.xlu1 %673, %v233_v4   ;;  %248 = vperm.xlu0 %672, %v233_v4  }
  0x45   : > { %675 = vset.pattern.permute.xlu1 %v823_v5  ;;  %674 = vset.pattern.permute.xlu0 %v823_v5 }
  0x46   : > { %305 = vperm.xlu1 %675, %v232_v3   ;;  %301 = vperm.xlu0 %674, %v231_v2  }
  0x4a   : > { %676 = vset.pattern.permute.xlu1 %v822_v1  ;;  %677 = vset.pattern.permute.xlu0 %v821_v0 }
  0x4b   : > { %253 = vperm.xlu1 %676, %v234_v6   ;;  %281 = vperm.xlu0 %677, %v234_v6  }
  0x4f   : > { %678 = vset.pattern.permute.xlu1 %v823_v5  ;;  %680 = vset.pattern.permute.xlu0 %v824_v7 }
  0x50   : > { %309 = vperm.xlu1 %678, %v233_v4   ;;  %337 = vperm.xlu0 %680, %v232_v3  }
  0x54   : > { %679 = vset.pattern.permute.xlu1 %v824_v7  ;;  %683 = vset.pattern.permute.xlu0 %v825_v8 }
  0x55   : > { %333 = vperm.xlu1 %679, %v231_v2   ;;  %365 = vperm.xlu0 %683, %v231_v2  }
  0x59   : > { %681 = vset.pattern.permute.xlu1 %v823_v5  ;;  %373 = vperm.xlu0 %683, %v233_v4  }
  0x5a   : > { %313 = vperm.xlu1 %681, %v234_v6  }
  0x5e   : > { %682 = vset.pattern.permute.xlu1 %v824_v7 }
  0x5f   : > { %341 = vperm.xlu1 %682, %v233_v4  }
  0x63   : > { %684 = vset.pattern.permute.xlu1 %v825_v8 }
  0x64   : > { %369 = vperm.xlu1 %684, %v232_v3  }
  0x68   : > { %685 = vset.pattern.permute.xlu1 %v824_v7 }
  0x69   : > { %345 = vperm.xlu1 %685, %v234_v6  }
  0x6d   : > { %686 = vset.pattern.permute.xlu1 %v825_v8 }
  0x6e   : > { %377 = vperm.xlu1 %686, %v234_v6  }
  0x92   : > { %436 = vadd.xlane.f32.xlu1 %v435_v19 }
  0xb4   : > { %v270_v20 = vpop.permute.xlu1 %269  ;;  %v239_v21 = vpop.permute.xlu0 %238 }
  0xb5   : > { %v288_v41 = vsub.f32 %v270_v20, %v287_v35  ;;  %v260_v42 = vsub.f32 %v239_v21, %v259_v36 }
  0xb7   : > { %v292_v48 = vmul.f32 %v288_v41, %v288_v41  ;;  %v264_v49 = vmul.f32 %v260_v42, %v260_v42 }
  0xb8   : > { %v274_v22 = vpop.permute.xlu1 %273  ;;  %v244_v23 = vpop.permute.xlu0 %243 }
  0xb9   : > { %v289_v54 = vsub.f32 %v274_v22, %v287_v35  ;;  %v261_v55 = vsub.f32 %v244_v23, %v259_v36  ;;  %v296_v60 = vadd.f32 %v292_v48, %v264_v49 }
  0xbb   : > { %v293_v2 = vmul.f32 %v289_v54, %v289_v54  ;;  %v265_v3 = vmul.f32 %v261_v55, %v261_v55 }
  0xbc   : > { %v278_v24 = vpop.permute.xlu1 %277  ;;  %v249_v26 = vpop.permute.xlu0 %248 }
  0xbd   : > { %v290_v50 = vsub.f32 %v278_v24, %v287_v35  ;;  %v262_v51 = vsub.f32 %v249_v26, %v259_v36  ;;  %v297_v19 = vadd.f32 %v293_v2, %v265_v3 }
  0xbf   : > { %v294_v62 = vmul.f32 %v290_v50, %v290_v50  ;;  %v266_v63 = vmul.f32 %v262_v51, %v262_v51 }
  0xc1   : > { %v306_v27 = vpop.permute.xlu1 %305  ;;  %v302_v29 = vpop.permute.xlu0 %301  ;;  %v298_v14 = vadd.f32 %v294_v62, %v266_v63 }
  0xc2   : > { %v320_v46 = vsub.f32 %v302_v29, %v319_v39  ;;  %v321_v61 = vsub.f32 %v306_v27, %v319_v39 }
  0xc4   : > { %v324_v58 = vmul.f32 %v320_v46, %v320_v46  ;;  %v325_v11 = vmul.f32 %v321_v61, %v321_v61 }
  0xc6   : > { %v254_v30 = vpop.permute.xlu1 %253  ;;  %v282_v37 = vpop.permute.xlu0 %281  ;;  %v328_v5 = vadd.f32 %v324_v58, %v296_v60  ;;  %v329_v23 = vadd.f32 %v325_v11, %v297_v19 }
  0xc7   : > { %v263_v24 = vsub.f32 %v254_v30, %v259_v36  ;;  %v291_v25 = vsub.f32 %v282_v37, %v287_v35 }
  0xc9   : > { %v295_v40 = vmul.f32 %v291_v25, %v291_v25 }
  0xcb   : > { %v310_v38 = vpop.permute.xlu1 %309  ;;  %v338_v45 = vpop.permute.xlu0 %337 }
  0xcc   : > { %v322_v59 = vsub.f32 %v310_v38, %v319_v39  ;;  %v353_v7 = vsub.f32 %v338_v45, %v351_v47  ;;  %v267_v38 = vmul.f32 %v263_v24, %v263_v24 }
  0xce   : > { %v326_v6 = vmul.f32 %v322_v59, %v322_v59  ;;  %v357_v22 = vmul.f32 %v353_v7, %v353_v7  ;;  %v299_v49 = vadd.f32 %v295_v40, %v267_v38 }
  0xd0   : > { %v334_v43 = vpop.permute.xlu1 %333  ;;  %v366_v56 = vpop.permute.xlu0 %365  ;;  %v330_v21 = vadd.f32 %v326_v6, %v298_v14  ;;  %v361_v32 = vadd.f32 %v357_v22, %v329_v23 }
  0xd1   : > { %v352_v52 = vsub.f32 %v334_v43, %v351_v47  ;;  %v384_v1 = vsub.f32 %v366_v56, %v383_v53 }
  0xd3   : > { %v356_v0 = vmul.f32 %v352_v52, %v352_v52  ;;  %v388_v17 = vmul.f32 %v384_v1, %v384_v1 }
  0xd4   : > { %v374_v4 = vpop.permute.xlu0 %373 }
  0xd5   : > { %v314_v57 = vpop.permute.xlu1 %313  ;;  %v360_v15 = vadd.f32 %v356_v0, %v328_v5  ;;  %v386_v18 = vsub.f32 %v374_v4, %v383_v53 }
  0xd6   : > { %v323_v33 = vsub.f32 %v314_v57, %v319_v39 }
  0xd7   : > { %v392_v27 = vadd.f32 %v388_v17, %v360_v15  ;;  %v390_v29 = vmul.f32 %v386_v18, %v386_v18 }
  0xd8   : > { %v327_v46 = vmul.f32 %v323_v33, %v323_v33 }
  0xd9   : > { %v396_v41 = vsub.f32 0.0, %v392_v27 }
  0xda   : > { %v342_v8 = vpop.permute.xlu1 %341  ;;  %v331_v51 = vadd.f32 %v327_v46, %v299_v49 }
  0xdb   : > { %v354_v12 = vsub.f32 %v342_v8, %v351_v47  ;;  %v400_v30 = vmul.f32 1.442695, %v396_v41 }
  0xdd   : > { %v358_v20 = vmul.f32 %v354_v12, %v354_v12 }
  0xdf   : > { %v370_v26 = vpop.permute.xlu1 %369  ;;  %v362_v28 = vadd.f32 %v358_v20, %v330_v21 }
  0xe0   : > { %v385_v31 = vsub.f32 %v370_v26, %v383_v53 }
  0xe1   : > { %v394_v42 = vadd.f32 %v390_v29, %v362_v28 }
  0xe2   : > { %v389_v34 = vmul.f32 %v385_v31, %v385_v31 }
  0xe3   : > { %v398_v35 = vsub.f32 0.0, %v394_v42 }
  0xe4   : > { %v393_v43 = vadd.f32 %v389_v34, %v361_v32  ;;  %v346_v44 = vpop.permute.xlu1 %345 }
  0xe5   : > { %v355_v45 = vsub.f32 %v346_v44, %v351_v47  ;;  %v404_v39 = vmul.f32 1.442695, %v398_v35 }
  0xe6   : > { %v397_v48 = vsub.f32 0.0, %v393_v43 }
  0xe7   : > { %v359_v37 = vmul.f32 %v355_v45, %v355_v45 }
  0xe8   : > { %v402_v36 = vmul.f32 1.442695, %v397_v48 }
  0xe9   : > { %v378_v50 = vpop.permute.xlu1 %377  ;;  %v363_v54 = vadd.f32 %v359_v37, %v331_v51 }
  0xea   : > { %687 = vpow2.f32 %v402_v36  ;;  %v387_v52 = vsub.f32 %v378_v50, %v383_v53 }
  0xeb   : > { %689 = vpow2.f32 %v400_v30 }
  0xec   : > { %v391_v55 = vmul.f32 %v387_v52, %v387_v52  ;;  %691 = vpow2.f32 %v404_v39 }
  0xee   : > { %v395_v56 = vadd.f32 %v391_v55, %v363_v54 }
  0xf0   : > { %v399_v57 = vsub.f32 0.0, %v395_v56 }
  0xf2   : > { %v406_v58 = vmul.f32 1.442695, %v399_v57 }
  0xf4   : > { %693 = vpow2.f32 %v406_v58 }
  0xf7   : > { %v688_v47 = vpop.eup %687 }
  0xf8   : > { %v690_v59 = vpop.eup %689  ;;  %v413_v60 = vmul.f32 %v688_v47, %v688_v47 }
  0xf9   : > { %v412_v61 = vmul.f32 %v690_v59, %v690_v59  ;;  %v692_v62 = vpop.eup %691 }
  0xfa   : > { %v414_v0 = vmul.f32 %v692_v62, %v692_v62 }
  0xfb   : > { %v416_v63 = vadd.f32 %v413_v60, %v412_v61 }
  0xfd   : > { %v417_v3 = vadd.f32 %v416_v63, %v414_v0 }
 0x101   : > { %v694_v1 = vpop.eup %693 }
 0x102   : > { %v415_v2 = vmul.f32 %v694_v1, %v694_v1 }
 0x104   : > { %v418_v53 = vadd.f32 %v417_v3, %v415_v2 }
 0x106   : > { %419 = vadd.xlane.f32.xlu0 %v418_v53 }
 0x11b   : > { %v437_v4 = vpop.xlane.xlu1 %436 }
 0x11c   : > { %v438_v5 = vrot.slane %v437_v4, 4 }
 0x11e   : > { %v439_v6 = vadd.f32 %v438_v5, %v437_v4 }
 0x120   : > { %v440_v7 = vrot.slane %v439_v6, 2 }
 0x122   : > { %v441_v14 = vadd.f32 %v440_v7, %v439_v6 }
 0x124   : > { %v442_v18 = vrot.slane %v441_v14, 1 }
 0x126   : > { %v443_v21 = vadd.f32 %v442_v18, %v441_v14 }
 0x18f   : > { %v420_v8 = vpop.xlane.xlu0 %419 }
 0x190   : > { %v421_v11 = vrot.slane %v420_v8, 4 }
 0x192   : > { %v422_v12 = vadd.f32 %v421_v11, %v420_v8 }
 0x194   : > { %v423_v15 = vrot.slane %v422_v12, 2 }
 0x196   : > { %v424_v17 = vadd.f32 %v423_v15, %v422_v12 }
 0x198   : > { %v425_v19 = vrot.slane %v424_v17, 1 }
 0x19a   : > { %v426_v20 = vadd.f32 %v425_v19, %v424_v17 }
 0x19c   : > { %603 = vpush %v426_v20 }
 0x19d   : > { %605 = vpush %v443_v21 }
 0x1cd   : > { %s604_s22 = spop %603 }
 0x1ce   : > { %s428_s23 = smul.f32 0.013, %s604_s22  ;;  %s606_s8 = spop %605 }
 0x1cf   : > { %s445_s10 = smul.f32 60.0, %s606_s8 }
 0x1d0   : > { %451 = sbr.rel (%p596_p12) target bundleno = 471 (0x1d7), region = 40 }
 0x1d1   : > { %s446_s11 = sadd.f32 %s445_s10, %s428_s23 }
 0x1d3   : > { %s447_s12 = smul.f32 0.00012207031, %s446_s11 }
 0x1d5   : > { %vm452_vm0 = vcmask 0   ;;  %v826_v22 = vmov 0.0  }
 0x1d6   : > { %453 = vst.msk [vmem:[#allocation6] sm:$0x1] %vm452_vm0, %v826_v22 }
 0x1d7 PF: > { %v455_v24 = vstv %s447_s12  ;;  %vm457_vm1 = vcmask 0   ;;  %v459_v25 = vmul.f32 %v690_v59, %v983_v9  ;;  %v460_v26 = vmul.f32 %v688_v47, %v986_v10  ;;  %s598_s29 = sshll.u32 %s878_s19, 7  ;;  %s480_s5 = sshll.u32 %s224_s25, 4  ;;  %s1020_s5 = int_to_ptr.vmem [resolvable:$true] %s480_s5 }
 0x1d8   : > { %v461_v28 = vmul.f32 %v692_v62, %v993_v13  ;;  %v462_v29 = vmul.f32 %v694_v1, %v998_v16  ;;  %s1018_s30 = scalar_lea.hbm %s1077_s3, %s598_s29  ;;  %s468_s6 = scalar_lea.sflag [#allocation4], %s958_s14 }
 0x1d9   : > { %463 = vst [vmem:[%s224_s25] sm:$0xff] %v459_v25  ;;  %464 = vst [vmem:[%s224_s25 + $0x8] sm:$0xff] %v460_v26  ;;  %s723_s7 = scalar_lea.vmem %s1020_s5, 512  ;;  %p1089_p2 = scmp.ne.s32.totalorder %s1084_s27, 0 }
 0x1da   : > { %465 = vst [vmem:[%s224_s25 + $0x10] sm:$0xff] %v461_v28  ;;  %466 = vst [vmem:[%s224_s25 + $0x18] sm:$0xff] %v462_v29  ;;  %p724_p13 = scmp.ne.s32.totalorder %s1020_s5, %s723_s7  ;;  %s827_s9 = smov [#allocation5]  }
 0x1db   : > { %s727_s13 = sshll.u32 %s827_s9, 4  ;;  %s728_s13 = int_to_ptr.vmem [resolvable:$false] %s727_s13 }
 0x1dc   : > { %p725_p4 = pnand %p724_p13, %p1089_p2  ;;  %s729_s22 = scalar_lea.vmem %s728_s13, 1024 }
 0x1dd   : > { %v454_v23 = vld [vmem:[#allocation6] sm:$0x1]  ;;  %p730_p8 = scmp.lt.s32.totalorder %s1020_s5, %s728_s13  ;;  %p731_p10 = scmp.lt.s32.totalorder %s729_s22, %s723_s7 }
 0x1de   : > { %v456_v27 = vadd.f32 %v455_v24, %v454_v23  ;;  %p726_p5 = pneg %p725_p4 }
 0x1df   : > { %p732_p1 = por %p731_p10, %p730_p8 }
 0x1e0   : > { %458 = vst.msk [vmem:[#allocation6] sm:$0x1] %vm457_vm1, %v456_v27 }
 0x1e1   : > { %p733_p3 = pnand %p732_p1, %p726_p5 }
 0x1e3   : > { %736 = shalt.err (!%p733_p3)
}
 0x1e4   : > { %s737_s23 = scalar_lea.hbm %s1018_s30, 512  ;;  %s741_s11 = scalar_lea.hbm %s1077_s3, 1024 }
 0x1e5   : > { %p738_p7 = scmp.ne.s32.totalorder %s1018_s30, %s737_s23  ;;  %p742_p6 = scmp.lt.s32.totalorder %s1018_s30, %s1077_s3 }
 0x1e6   : > { %p743_p11 = scmp.lt.s32.totalorder %s741_s11, %s737_s23 }
 0x1e7   : > { %p739_p9 = pnand %p738_p7, %p1089_p2 }
 0x1e8   : > { %p744_p12 = por %p743_p11, %p742_p6 }
 0x1e9   : > { %p740_p0 = pneg %p739_p9 }
 0x1eb   : > { %p745_p13 = pnand %p744_p12, %p740_p0 }
 0x1ed   : > { %748 = shalt.err (!%p745_p13)
}
 0x1ee   : > { %s828_s29 = smov 128   ;;  %s829_s20 = smov 256  }
 0x1ef   : > { %s830_s26 = smov 8   ;;  %s831_s7 = smov [#allocation6]  }
 0x1f0   : > { %609 = dma.vmem_to_hbm [thread:$0]  (%p1089_p2), %s1020_s5, 512, %s1018_s30, %s468_s6, %s828_s29, %s829_s20, %s830_s26  }
 0x1f1   : > { %s494_s9 = sshll.u32 %s831_s7, 4  ;;  %p1090_p5 = scmp.eq.s32.totalorder %s878_s19, 1  ;;  %s495_s9 = int_to_ptr.vmem [resolvable:$true] %s494_s9 }
 0x1f2   : > { %s749_s13 = scalar_lea.vmem %s495_s9, 16  ;;  %s755_s22 = scalar_lea.vmem %s495_s9, 32 }
 0x1f3   : > { %p750_p4 = scmp.ne.s32.totalorder %s495_s9, %s749_s13  ;;  %p756_p1 = scmp.lt.s32.totalorder %s495_s9, %s495_s9 }
 0x1f4   : > { %p757_p3 = scmp.lt.s32.totalorder %s755_s22, %s749_s13 }
 0x1f5   : > { %p751_p8 = pnand %p750_p4, %p1090_p5 }
 0x1f6   : > { %p758_p7 = por %p757_p3, %p756_p1 }
 0x1f7   : > { %p752_p10 = pneg %p751_p8 }
 0x1f9   : > { %p759_p9 = pnand %p758_p7, %p752_p10 }
 0x1fb   : > { %762 = shalt.err (!%p759_p9)
}
 0x1fc   : > { %p1091_p0 = pmov %p1090_p5 }
 0x1fe   : > { %611 = dma.vmem_to_hbm [thread:$0]  (%p1091_p0), %s495_s9, 16, %s1078_s4, [#allocation7]  }
 0x1ff   : > { %p1092_p2 = pmov %p1091_p0 }
 0x200   : > { %p1093_p6 = pmov %p1091_p0 }
 0x201   : > { %794 = dma.done.wait (%p1092_p2), [#allocation7], 16  }
 0x202   : > { %796 = vsyncadd (%p1093_p6), [#allocation7], 4294967280 }
 0x203 PF: > { %s510_s14 = sand.u32 1, %s803_s15   ;;  %p1094_p11 = scmp.ne.s32.totalorder %s1085_s28, 0 }
 0x204   : > { %p1095_p12 = scmp.ge.s32.totalorder %s815_s18, 2  ;;  %s511_s30 = scalar_lea.sflag [#allocation4], %s510_s14 }
 0x206   : > { %p620_p13 = pnand %p1095_p12, %p1094_p11 }
 0x208   : > { %p621_p4 = pneg %p620_p13 }
 0x20a   : > { %798 = dma.done.wait (%p621_p4), %s511_s30, 512  }
 0x20b   : > { %800 = vsyncadd (%p621_p4), %s511_s30, 4294966784  ;;  %p19_p5 = scmp.ge.s32.totalorder %s882_s21, 4   ;;  %s1096_s15 = smov %s807_s16 }
 0x20c   : > { %s1097_s16 = smov %s811_s17  ;;  %s1098_s17 = smov %s894_s24 }
 0x20d   : > { %s1099_s18 = smov %s882_s21  ;;  %21 = sbr.rel (!%p19_p5) target bundleno = 6 (0x6), region = 92 }
 0x212   :  { %516 = vsyncpa [#allocation3], 1 }
 0x213   :  { %518 = vsyncpa [#allocation3 + $0x1], 1 }
 0x214   :  { %519 = vsyncpa [#allocation4], 1 }
 0x215   :  { %521 = vsyncpa [#allocation4 + $0x1], 1 }
 0x216   :  { %522 = vsyncpa [#allocation7], 1 }

</bundles_post_ra>
